<compile_context>
chip_gen: v7x
topology: tpu7x:2x2x1
jax: 0.10.0
libtpu: 0.0.40
codegen_flags: <defaults>
</compile_context>

<pallas_src>
import functools

import jax
import jax.numpy as jnp
from jax import lax
from jax.experimental import pallas as pl
from jax.experimental.pallas import tpu as pltpu


# --------------------------- pass 1: stats / weights ---------------------------
def lrc_stats_kernel(x_ref, w1_ref, wz_ref,
                     chv_b_ref, spq_b_ref, spv_b_ref,
                     bz_ref, ln_g_ref, ln_b_ref,
                     chw_ref, p2_ref, spzb_ref,
                     m_sc, s_sc, chz_sc, spq_sc,
                     *, n_valid, needs_mask):
    k = pl.program_id(1)

    @pl.when(k == 0)
    def _():
        m_sc[...] = jnp.full_like(m_sc, -jnp.inf)
        s_sc[...] = jnp.zeros_like(s_sc)
        chz_sc[...] = jnp.zeros_like(chz_sc)
        spq_sc[...] = jnp.zeros_like(spq_sc)

    x = x_ref[0]                              # (C, tn) io dtype
    c = x.shape[0]
    hc = c // 2

    # Fused projections [ch_wv | sp_wq | ch_wq] @ x -- one MXU matmul, f32 acc.
    # All biases are folded out of this full-width path (see header).
    proj = jnp.dot(w1_ref[...], x, preferred_element_type=jnp.float32)   # (C+1, tn)
    chv = proj[0:hc]                          # (C/2, tn)
    spq = proj[hc:2 * hc]                     # (C/2, tn)
    chq = proj[2 * hc:2 * hc + 1]             # (1,   tn)

    if needs_mask:
        lane = lax.broadcasted_iota(jnp.int32, chq.shape, 1) + k * chq.shape[1]
        chq = jnp.where(lane < n_valid, chq, -jnp.inf)

    # Online softmax over N (lane axis) for the channel branch.
    m_new = jnp.maximum(m_sc[...], jnp.max(chq, axis=1, keepdims=True))  # (1, 1)
    alpha = jnp.exp(m_sc[...] - m_new)
    e = jnp.exp(chq - m_new)                                             # (1, tn)
    s_sc[...] = alpha * s_sc[...] + jnp.sum(e, axis=1, keepdims=True)
    # Partial chz: contraction over the lane axis on the MXU.
    chz_sc[...] = alpha * chz_sc[...] + lax.dot_general(
        chv, e, (((1,), (1,)), ((), ())), preferred_element_type=jnp.float32)
    m_sc[...] = m_new

    # Running spatial-pool sum (padded lanes contribute exactly 0).
    spq_sc[...] += jnp.sum(spq, axis=1, keepdims=True)

    @pl.when(k == pl.num_programs(1) - 1)
    def _():
        # ---- channel branch finalize (tiny (C,1) math, once per batch) ----
        chz = chz_sc[...] / s_sc[...] + chv_b_ref[...]                   # (C/2, 1)
        wz = jnp.dot(wz_ref[...], chz,
                     preferred_element_type=jnp.float32) + bz_ref[...]   # (C, 1)
        mu = jnp.mean(wz, axis=0, keepdims=True)
        var = jnp.mean(jnp.square(wz - mu), axis=0, keepdims=True)
        ln = (wz - mu) * lax.rsqrt(var + 1e-5) * ln_g_ref[...] + ln_b_ref[...]
        chw_ref[0] = jax.nn.sigmoid(ln)                                  # (C, 1)

        # ---- spatial branch finalize: softmax over C/2 of the pooled mean ----
        spq_mean = spq_sc[...] / jnp.float32(n_valid) + spq_b_ref[...]   # (C/2, 1)
        m2 = jnp.max(spq_mean, axis=0, keepdims=True)
        e2 = jnp.exp(spq_mean - m2)
        p2 = e2 / jnp.sum(e2, axis=0, keepdims=True)                     # (C/2, 1)
        p2_ref[0] = p2
        # Folded sp_wv bias: scalar p2 . sp_wv_b
        spzb_ref[0] = jnp.sum(p2 * spv_b_ref[...], axis=0, keepdims=True)


# ------------------------------ pass 2: apply ----------------------------------
def lrc_apply_kernel(x_ref, w2_ref, chw_ref, p2_ref, spzb_ref, o_ref):
    x = x_ref[0]                                                         # (C, tn)
    # spv = sp_wv @ x on the MXU (bias folded into spzb).
    spv = jnp.dot(w2_ref[...], x, preferred_element_type=jnp.float32)    # (C/2, tn)
    # spz = p2^T @ spv on the MXU (contraction over C/2), plus folded bias.
    spz = lax.dot_general(p2_ref[0], spv, (((0,), (0,)), ((), ())),
                          preferred_element_type=jnp.float32) + spzb_ref[0]  # (1, tn)
    # Epilogue in the I/O dtype: one broadcast-add + one multiply, lane-dense.
    total = jax.nn.sigmoid(spz).astype(x.dtype) + chw_ref[0].astype(x.dtype)
    o_ref[0] = (x * total).astype(o_ref.dtype)


# --------------------------------- wrapper --------------------------------------
def _round_up(v, m):
    return ((v + m - 1) // m) * m


def lrc_pallas(x, params, io_dtype=jnp.bfloat16):
    """x: (b, c, h, w, d) float32 in PyTorch NCDHW layout."""
    b, c, h, w, d = x.shape
    n = h * w * d
    hc = c // 2
    item = jnp.dtype(io_dtype).itemsize

    # ---- per-generation VMEM sizing -------------------------------------------
    try:
        vmem_cap = int(pltpu.get_tpu_info().vmem_capacity_bytes)   # per TensorCore
    except Exception:
        vmem_cap = 64 << 20
    # Lane-tile: biggest multiple of 128 whose working set (double-buffered x and
    # out blocks + f32 proj/temporaries) fits in ~1/3 of physical VMEM.
    bytes_per_lane = 2 * c * item + 2 * c * item + (2 * c + hc + 8) * 4
    ws_target = max(min(vmem_cap, 128 << 20) // 3, 8 << 20)
    tn = max(128, min(8192, (ws_target // bytes_per_lane) // 128 * 128))
    tn = min(tn, _round_up(n, 128))
    n_tiles = -(-n // tn)
    n_pad = n_tiles * tn
    est = bytes_per_lane * tn + ((c + 1) * c + hc * c) * 4
    vmem_limit = int(min(max(int(1.5 * est) + (8 << 20), 32 << 20),
                         vmem_cap - (12 << 20), 110 << 20))

    # channels-first (b, C, N): free reshape of NCDHW, lane-dense, padded to tn.
    x_cn = x.reshape(b, c, n).astype(io_dtype)
    if n_pad != n:
        x_cn = jnp.pad(x_cn, ((0, 0), (0, 0), (0, n_pad - n)))

    # Fused pass-1 projection weights: rows = [ch_wv | sp_wq | ch_wq].
    w1 = jnp.concatenate([params['ch_wv_w'], params['sp_wq_w'],
                          params['ch_wq_w']], axis=0).astype(io_dtype)    # (C+1, C)
    w2 = params['sp_wv_w'].astype(io_dtype)                               # (C/2, C)
    wz = params['ch_wz_w'].astype(jnp.float32)                            # (C, C/2)
    chv_b = params['ch_wv_b'][:, None].astype(jnp.float32)                # (C/2, 1)
    spq_b = params['sp_wq_b'][:, None].astype(jnp.float32)                # (C/2, 1)
    spv_b = params['sp_wv_b'][:, None].astype(jnp.float32)                # (C/2, 1)
    bz = params['ch_wz_b'][:, None].astype(jnp.float32)                   # (C, 1)
    ln_g = params['ln_g'][:, None].astype(jnp.float32)                    # (C, 1)
    ln_b = params['ln_b'][:, None].astype(jnp.float32)                    # (C, 1)

    small = (w1, wz, chv_b, spq_b, spv_b, bz, ln_g, ln_b)
    # Constant index_map => parameter blocks stay resident across the grid.
    # TODO(synk): pipeline_mode=pl.Buffered(1) would also drop their 2nd VMEM
    # buffer; omitted to stay conservative across jax versions.
    small_specs = [pl.BlockSpec(a.shape, lambda i, k: (0, 0)) for a in small]

    # ----------------------------- pass 1: stats -------------------------------
    chw, p2, spzb = pl.pallas_call(
        functools.partial(lrc_stats_kernel, n_valid=n, needs_mask=(n_pad != n)),
        out_shape=(jax.ShapeDtypeStruct((b, c, 1), jnp.float32),
                   jax.ShapeDtypeStruct((b, hc, 1), jnp.float32),
                   jax.ShapeDtypeStruct((b, 1, 1), jnp.float32)),
        grid_spec=pltpu.PrefetchScalarGridSpec(
            num_scalar_prefetch=0,
            grid=(b, n_tiles),
            in_specs=[pl.BlockSpec((1, c, tn), lambda i, k: (i, 0, k))] + small_specs,
            out_specs=[pl.BlockSpec((1, c, 1), lambda i, k: (i, 0, 0)),
                       pl.BlockSpec((1, hc, 1), lambda i, k: (i, 0, 0)),
                       pl.BlockSpec((1, 1, 1), lambda i, k: (i, 0, 0))],
            scratch_shapes=[pltpu.VMEM((1, 1), jnp.float32),
                            pltpu.VMEM((1, 1), jnp.float32),
                            pltpu.VMEM((hc, 1), jnp.float32),
                            pltpu.VMEM((hc, 1), jnp.float32)]),
        compiler_params=pltpu.CompilerParams(
            dimension_semantics=("parallel", "arbitrary"),
            vmem_limit_bytes=vmem_limit),
    )(x_cn, *small)

    # ----------------------------- pass 2: apply -------------------------------
    out = pl.pallas_call(
        lrc_apply_kernel,
        out_shape=jax.ShapeDtypeStruct((b, c, n_pad), io_dtype),
        grid_spec=pltpu.PrefetchScalarGridSpec(
            num_scalar_prefetch=0,
            grid=(b, n_tiles),
            in_specs=[pl.BlockSpec((1, c, tn), lambda i, k: (i, 0, k)),
                      pl.BlockSpec(w2.shape, lambda i, k: (0, 0)),
                      pl.BlockSpec((1, c, 1), lambda i, k: (i, 0, 0)),
                      pl.BlockSpec((1, hc, 1), lambda i, k: (i, 0, 0)),
                      pl.BlockSpec((1, 1, 1), lambda i, k: (i, 0, 0))],
            out_specs=pl.BlockSpec((1, c, tn), lambda i, k: (i, 0, k))),
        compiler_params=pltpu.CompilerParams(
            dimension_semantics=("parallel", "parallel"),
            vmem_limit_bytes=vmem_limit),
    )(x_cn, w2, chw, p2, spzb)

    if n_pad != n:
        out = out[:, :, :n]
    return out.reshape(b, c, h, w, d)


# ------------------- pure-JAX reference (mirrors PyTorch forward) -------------------
def _conv1x1(x, w, bias):
    y = jnp.einsum('bi...,oi->bo...', x, w)
    return y + bias.reshape((1, -1) + (1,) * (x.ndim - 2))


def lrc_ref(x, p):
    b, c, h, w, d = x.shape
    cwv = _conv1x1(x, p['ch_wv_w'], p['ch_wv_b']).reshape(b, c // 2, -1)
    cwq = _conv1x1(x, p['ch_wq_w'], p['ch_wq_b']).reshape(b, -1, 1)
    cwq = jax.nn.softmax(cwq, axis=1)
    cwz = jnp.matmul(cwv, cwq)[..., None, None]
    z = _conv1x1(cwz, p['ch_wz_w'], p['ch_wz_b']).reshape(b, c, 1).transpose(0, 2, 1)
    mean = jnp.mean(z, axis=-1, keepdims=True)
    var = jnp.mean(jnp.square(z - mean), axis=-1, keepdims=True)
    z = (z - mean) / jnp.sqrt(var + 1e-5) * p['ln_g'] + p['ln_b']
    channel_weight = jax.nn.sigmoid(z).transpose(0, 2, 1).reshape(b, c, 1, 1, 1)
    channel_out = channel_weight * x
    swv = _conv1x1(x, p['sp_wv_w'], p['sp_wv_b']).reshape(b, c // 2, -1)
    swq = _conv1x1(x, p['sp_wq_w'], p['sp_wq_b']).mean(axis=(2, 3, 4)).reshape(b, 1, c // 2)
    swq = jax.nn.softmax(swq, axis=-1)
    swz = jnp.matmul(swq, swv)
    spatial_weight = jax.nn.sigmoid(swz.reshape(b, 1, h, w, d))
    spatial_out = spatial_weight * x
    return spatial_out + channel_out


def make_params(key, c, scale=0.1):
    ks = jax.random.split(key, 12)
    return {
        'ch_wv_w': scale * jax.random.normal(ks[0], (c // 2, c), jnp.float32),
        'ch_wv_b': scale * jax.random.normal(ks[1], (c // 2,), jnp.float32),
        'ch_wq_w': scale * jax.random.normal(ks[2], (1, c), jnp.float32),
        'ch_wq_b': scale * jax.random.normal(ks[3], (1,), jnp.float32),
        'ch_wz_w': scale * jax.random.normal(ks[4], (c, c // 2), jnp.float32),
        'ch_wz_b': scale * jax.random.normal(ks[5], (c,), jnp.float32),
        'sp_wv_w': scale * jax.random.normal(ks[6], (c // 2, c), jnp.float32),
        'sp_wv_b': scale * jax.random.normal(ks[7], (c // 2,), jnp.float32),
        'sp_wq_w': scale * jax.random.normal(ks[8], (c // 2, c), jnp.float32),
        'sp_wq_b': scale * jax.random.normal(ks[9], (c // 2,), jnp.float32),
        'ln_g': 1.0 + scale * jax.random.normal(ks[10], (c,), jnp.float32),
        'ln_b': scale * jax.random.normal(ks[11], (c,), jnp.float32),
    }


if __name__ == "__main__":
    key = jax.random.PRNGKey(0)

    # --- test 1: lane-dense shape (N = 512, multiple of 128) ---
    B, C, H, W, D = 2, 16, 8, 8, 8
    k_p, k_x, key = jax.random.split(key, 3)
    params = make_params(k_p, C)
    x = jax.random.normal(k_x, (B, C, H, W, D), jnp.float32)
    ref = jax.block_until_ready(lrc_ref(x, params))

    # f32-I/O path (tight tolerance; exact softmax normalizers).
    out_f32 = jax.block_until_ready(lrc_pallas(x, params, io_dtype=jnp.float32))
    assert out_f32.shape == (B, C, H, W, D)
    err = float(jnp.max(jnp.abs(out_f32.astype(jnp.float32) - ref)))
    assert jnp.allclose(out_f32.astype(jnp.float32), ref, atol=2e-3, rtol=2e-3), \
        f"f32 path max abs err {err}"

    # default bf16-I/O path (HBM-bound kernel -> bf16 in AND out).
    out_bf16 = jax.block_until_ready(lrc_pallas(x, params))
    assert out_bf16.shape == (B, C, H, W, D)
    assert out_bf16.dtype == jnp.bfloat16
    err = float(jnp.max(jnp.abs(out_bf16.astype(jnp.float32) - ref)))
    assert jnp.allclose(out_bf16.astype(jnp.float32), ref, atol=8e-2, rtol=8e-2), \
        f"bf16 path max abs err {err}"

    # --- test 2: ragged N (5*5*5 = 125 -> padded & masked to 128), batch 1 ---
    B2, C2, H2, W2, D2 = 1, 8, 5, 5, 5
    k_p2, k_x2 = jax.random.split(key, 2)
    params2 = make_params(k_p2, C2)
    x2 = jax.random.normal(k_x2, (B2, C2, H2, W2, D2), jnp.float32)
    ref2 = jax.block_until_ready(lrc_ref(x2, params2))
    out2 = jax.block_until_ready(lrc_pallas(x2, params2, io_dtype=jnp.float32))
    err2 = float(jnp.max(jnp.abs(out2.astype(jnp.float32) - ref2)))
    assert jnp.allclose(out2.astype(jnp.float32), ref2, atol=2e-3, rtol=2e-3), \
        f"ragged-N path max abs err {err2}"

    print("KERNEL_OK")
</pallas_src>

<mosaic_0001>
module attributes {stable_mosaic.version = 11 : i64} {
  func.func @lrc_stats_kernel(%arg0: i32, %arg1: i32, %arg2: memref<1x16x512xf32, #tpu.memory_space<vmem>>, %arg3: memref<17x16xf32, #tpu.memory_space<vmem>>, %arg4: memref<16x8xf32, #tpu.memory_space<vmem>>, %arg5: memref<8x1xf32, #tpu.memory_space<vmem>>, %arg6: memref<8x1xf32, #tpu.memory_space<vmem>>, %arg7: memref<8x1xf32, #tpu.memory_space<vmem>>, %arg8: memref<16x1xf32, #tpu.memory_space<vmem>>, %arg9: memref<16x1xf32, #tpu.memory_space<vmem>>, %arg10: memref<16x1xf32, #tpu.memory_space<vmem>>, %arg11: memref<1x16x1xf32, #tpu.memory_space<vmem>>, %arg12: memref<1x8x1xf32, #tpu.memory_space<vmem>>, %arg13: memref<1x1x1xf32, #tpu.memory_space<vmem>>, %arg14: memref<1x1xf32, #tpu.memory_space<vmem>>, %arg15: memref<1x1xf32, #tpu.memory_space<vmem>>, %arg16: memref<8x1xf32, #tpu.memory_space<vmem>>, %arg17: memref<8x1xf32, #tpu.memory_space<vmem>>) attributes {dimension_semantics = [#tpu.dimension_semantics<parallel>, #tpu.dimension_semantics<arbitrary>], iteration_bounds = array<i64: 2, 1>, scalar_prefetch = 0 : i64, scratch_operands = 4 : i64, tpu.core_type = #tpu.core_type<tc>, window_params = [{transform_indices = @transform_0, window_bounds = array<i64: 1, 16, 512>}, {pipeline_mode = #tpu.pipeline_mode<synchronous>, transform_indices = @transform_1, window_bounds = array<i64: 17, 16>}, {pipeline_mode = #tpu.pipeline_mode<synchronous>, transform_indices = @transform_2, window_bounds = array<i64: 16, 8>}, {pipeline_mode = #tpu.pipeline_mode<synchronous>, transform_indices = @transform_3, window_bounds = array<i64: 8, 1>}, {pipeline_mode = #tpu.pipeline_mode<synchronous>, transform_indices = @transform_4, window_bounds = array<i64: 8, 1>}, {pipeline_mode = #tpu.pipeline_mode<synchronous>, transform_indices = @transform_5, window_bounds = array<i64: 8, 1>}, {pipeline_mode = #tpu.pipeline_mode<synchronous>, transform_indices = @transform_6, window_bounds = array<i64: 16, 1>}, {pipeline_mode = #tpu.pipeline_mode<synchronous>, transform_indices = @transform_7, window_bounds = array<i64: 16, 1>}, {pipeline_mode = #tpu.pipeline_mode<synchronous>, transform_indices = @transform_8, window_bounds = array<i64: 16, 1>}, {transform_indices = @transform_9, window_bounds = array<i64: 1, 16, 1>}, {transform_indices = @transform_10, window_bounds = array<i64: 1, 8, 1>}, {transform_indices = @transform_11, window_bounds = array<i64: 1, 1, 1>}]} {
    %c0_i32 = arith.constant 0 : i32
    %0 = arith.cmpi eq, %arg1, %c0_i32 : i32
    %1 = arith.extui %0 : i1 to i32
    %c0_i32_0 = arith.constant 0 : i32
    %2 = arith.cmpi ne, %1, %c0_i32_0 : i32
    scf.if %2 {
      %cst_29 = arith.constant 0xFF800000 : f32
      %41 = vector.broadcast %cst_29 : f32 to vector<1x1xf32>
      %c0_30 = arith.constant 0 : index
      %c0_31 = arith.constant 0 : index
      %42 = vector.load %arg14[%c0_30, %c0_31] : memref<1x1xf32, #tpu.memory_space<vmem>>, vector<1x1xf32>
      tpu.vector_store %arg14[%c0_30, %c0_31], %41 {strides = array<i32>} : memref<1x1xf32, #tpu.memory_space<vmem>>, vector<1x1xf32>,
      %cst_32 = arith.constant 0.000000e+00 : f32
      %43 = vector.broadcast %cst_32 : f32 to vector<1x1xf32>
      %c0_33 = arith.constant 0 : index
      %c0_34 = arith.constant 0 : index
      %44 = vector.load %arg15[%c0_33, %c0_34] : memref<1x1xf32, #tpu.memory_space<vmem>>, vector<1x1xf32>
      tpu.vector_store %arg15[%c0_33, %c0_34], %43 {strides = array<i32>} : memref<1x1xf32, #tpu.memory_space<vmem>>, vector<1x1xf32>,
      %cst_35 = arith.constant 0.000000e+00 : f32
      %45 = vector.broadcast %cst_35 : f32 to vector<8x1xf32>
      %c0_36 = arith.constant 0 : index
      %c0_37 = arith.constant 0 : index
      %46 = vector.load %arg16[%c0_36, %c0_37] : memref<8x1xf32, #tpu.memory_space<vmem>>, vector<8x1xf32>
      tpu.vector_store %arg16[%c0_36, %c0_37], %45 {strides = array<i32>} : memref<8x1xf32, #tpu.memory_space<vmem>>, vector<8x1xf32>,
      %cst_38 = arith.constant 0.000000e+00 : f32
      %47 = vector.broadcast %cst_38 : f32 to vector<8x1xf32>
      %c0_39 = arith.constant 0 : index
      %c0_40 = arith.constant 0 : index
      %48 = vector.load %arg17[%c0_39, %c0_40] : memref<8x1xf32, #tpu.memory_space<vmem>>, vector<8x1xf32>
      tpu.vector_store %arg17[%c0_39, %c0_40], %47 {strides = array<i32>} : memref<8x1xf32, #tpu.memory_space<vmem>>, vector<8x1xf32>,
    } else {
    }
    %c0 = arith.constant 0 : index
    %c0_1 = arith.constant 0 : index
    %c0_2 = arith.constant 0 : index
    %3 = vector.load %arg2[%c0, %c0_1, %c0_2] : memref<1x16x512xf32, #tpu.memory_space<vmem>>, vector<1x16x512xf32>
    %4 = vector.shape_cast %3 : vector<1x16x512xf32> to vector<16x512xf32>
    %c0_3 = arith.constant 0 : index
    %c0_4 = arith.constant 0 : index
    %5 = vector.load %arg3[%c0_3, %c0_4] : memref<17x16xf32, #tpu.memory_space<vmem>>, vector<17x16xf32>
    %cst = arith.constant dense<0.000000e+00> : vector<17x512xf32>
    %6 = tpu.matmul %5, %4, %cst {dimension_numbers = #tpu.dot_dimension_numbers<[1], [0], [0], [1], [0, 0, 1, 1], [], []>} : vector<17x16xf32>, vector<16x512xf32>, vector<17x512xf32> -> vector<17x512xf32>
    %7 = vector.extract_strided_slice %6 {offsets = [0, 0], sizes = [8, 512], strides = [1, 1]} : vector<17x512xf32> to vector<8x512xf32>
    %8 = vector.extract_strided_slice %6 {offsets = [8, 0], sizes = [8, 512], strides = [1, 1]} : vector<17x512xf32> to vector<8x512xf32>
    %9 = vector.extract_strided_slice %6 {offsets = [16, 0], sizes = [1, 512], strides = [1, 1]} : vector<17x512xf32> to vector<1x512xf32>
    %c0_5 = arith.constant 0 : index
    %c0_6 = arith.constant 0 : index
    %10 = vector.load %arg14[%c0_5, %c0_6] : memref<1x1xf32, #tpu.memory_space<vmem>>, vector<1x1xf32>
    %cst_7 = arith.constant dense<0xFF800000> : vector<1xf32>
    %11 = vector.multi_reduction <maximumf>, %9, %cst_7 [1] : vector<1x512xf32> to vector<1xf32>
    %12 = vector.shape_cast %11 : vector<1xf32> to vector<1x1xf32>
    %13 = arith.maximumf %10, %12 : vector<1x1xf32>
    %c0_8 = arith.constant 0 : index
    %c0_9 = arith.constant 0 : index
    %14 = vector.load %arg14[%c0_8, %c0_9] : memref<1x1xf32, #tpu.memory_space<vmem>>, vector<1x1xf32>
    %15 = arith.subf %14, %13 : vector<1x1xf32>
    %16 = math.exp %15 : vector<1x1xf32>
    %17 = vector.broadcast %13 : vector<1x1xf32> to vector<1x512xf32>
    %18 = arith.subf %9, %17 : vector<1x512xf32>
    %19 = math.exp %18 : vector<1x512xf32>
    %c0_10 = arith.constant 0 : index
    %c0_11 = arith.constant 0 : index
    %20 = vector.load %arg15[%c0_10, %c0_11] : memref<1x1xf32, #tpu.memory_space<vmem>>, vector<1x1xf32>
    %21 = arith.mulf %16, %20 : vector<1x1xf32>
    %cst_12 = arith.constant dense<0.000000e+00> : vector<1xf32>
    %22 = vector.multi_reduction <add>, %19, %cst_12 [1] : vector<1x512xf32> to vector<1xf32>
    %23 = vector.shape_cast %22 : vector<1xf32> to vector<1x1xf32>
    %24 = arith.addf %21, %23 : vector<1x1xf32>
    %c0_13 = arith.constant 0 : index
    %c0_14 = arith.constant 0 : index
    %25 = vector.load %arg15[%c0_13, %c0_14] : memref<1x1xf32, #tpu.memory_space<vmem>>, vector<1x1xf32>
    tpu.vector_store %arg15[%c0_13, %c0_14], %24 {strides = array<i32>} : memref<1x1xf32, #tpu.memory_space<vmem>>, vector<1x1xf32>,
    %c0_15 = arith.constant 0 : index
    %c0_16 = arith.constant 0 : index
    %26 = vector.load %arg16[%c0_15, %c0_16] : memref<8x1xf32, #tpu.memory_space<vmem>>, vector<8x1xf32>
    %27 = vector.broadcast %16 : vector<1x1xf32> to vector<8x1xf32>
    %28 = arith.mulf %27, %26 : vector<8x1xf32>
    %cst_17 = arith.constant dense<0.000000e+00> : vector<8x1xf32>
    %29 = tpu.matmul %7, %19, %cst_17 {dimension_numbers = #tpu.dot_dimension_numbers<[1], [1], [0], [0], [0, 0, 1, 0], [], []>} : vector<8x512xf32>, vector<1x512xf32>, vector<8x1xf32> -> vector<8x1xf32>
    %30 = arith.addf %28, %29 : vector<8x1xf32>
    %c0_18 = arith.constant 0 : index
    %c0_19 = arith.constant 0 : index
    %31 = vector.load %arg16[%c0_18, %c0_19] : memref<8x1xf32, #tpu.memory_space<vmem>>, vector<8x1xf32>
    tpu.vector_store %arg16[%c0_18, %c0_19], %30 {strides = array<i32>} : memref<8x1xf32, #tpu.memory_space<vmem>>, vector<8x1xf32>,
    %c0_20 = arith.constant 0 : index
    %c0_21 = arith.constant 0 : index
    %32 = vector.load %arg14[%c0_20, %c0_21] : memref<1x1xf32, #tpu.memory_space<vmem>>, vector<1x1xf32>
    tpu.vector_store %arg14[%c0_20, %c0_21], %13 {strides = array<i32>} : memref<1x1xf32, #tpu.memory_space<vmem>>, vector<1x1xf32>,
    %c0_22 = arith.constant 0 : index
    %c0_23 = arith.constant 0 : index
    %33 = vector.load %arg17[%c0_22, %c0_23] : memref<8x1xf32, #tpu.memory_space<vmem>>, vector<8x1xf32>
    %cst_24 = arith.constant dense<0.000000e+00> : vector<8xf32>
    %34 = vector.multi_reduction <add>, %8, %cst_24 [1] : vector<8x512xf32> to vector<8xf32>
    %35 = vector.shape_cast %34 : vector<8xf32> to vector<8x1xf32>
    %36 = arith.addf %33, %35 : vector<8x1xf32>
    %c0_25 = arith.constant 0 : index
    %c0_26 = arith.constant 0 : index
    %37 = vector.load %arg17[%c0_25, %c0_26] : memref<8x1xf32, #tpu.memory_space<vmem>>, vector<8x1xf32>
    tpu.vector_store %arg17[%c0_25, %c0_26], %36 {strides = array<i32>} : memref<8x1xf32, #tpu.memory_space<vmem>>, vector<8x1xf32>,
    %c0_i32_27 = arith.constant 0 : i32
    %38 = arith.cmpi eq, %arg1, %c0_i32_27 : i32
    %39 = arith.extui %38 : i1 to i32
    %c0_i32_28 = arith.constant 0 : i32
    %40 = arith.cmpi ne, %39, %c0_i32_28 : i32
    scf.if %40 {
      %c0_29 = arith.constant 0 : index
      %c0_30 = arith.constant 0 : index
      %41 = vector.load %arg16[%c0_29, %c0_30] : memref<8x1xf32, #tpu.memory_space<vmem>>, vector<8x1xf32>
      %c0_31 = arith.constant 0 : index
      %c0_32 = arith.constant 0 : index
      %42 = vector.load %arg15[%c0_31, %c0_32] : memref<1x1xf32, #tpu.memory_space<vmem>>, vector<1x1xf32>
      %43 = vector.broadcast %42 : vector<1x1xf32> to vector<8x1xf32>
      %44 = arith.divf %41, %43 : vector<8x1xf32>
      %c0_33 = arith.constant 0 : index
      %c0_34 = arith.constant 0 : index
      %45 = vector.load %arg5[%c0_33, %c0_34] : memref<8x1xf32, #tpu.memory_space<vmem>>, vector<8x1xf32>
      %46 = arith.addf %44, %45 : vector<8x1xf32>
      %c0_35 = arith.constant 0 : index
      %c0_36 = arith.constant 0 : index
      %47 = vector.load %arg4[%c0_35, %c0_36] : memref<16x8xf32, #tpu.memory_space<vmem>>, vector<16x8xf32>
      %cst_37 = arith.constant dense<0.000000e+00> : vector<16x1xf32>
      %48 = tpu.matmul %47, %46, %cst_37 {dimension_numbers = #tpu.dot_dimension_numbers<[1], [0], [0], [1], [0, 0, 1, 1], [], []>} : vector<16x8xf32>, vector<8x1xf32>, vector<16x1xf32> -> vector<16x1xf32>
      %c0_38 = arith.constant 0 : index
      %c0_39 = arith.constant 0 : index
      %49 = vector.load %arg8[%c0_38, %c0_39] : memref<16x1xf32, #tpu.memory_space<vmem>>, vector<16x1xf32>
      %50 = arith.addf %48, %49 : vector<16x1xf32>
      %cst_40 = arith.constant dense<0.000000e+00> : vector<1xf32>
      %51 = vector.multi_reduction <add>, %50, %cst_40 [0] : vector<16x1xf32> to vector<1xf32>
      %52 = vector.shape_cast %51 : vector<1xf32> to vector<1x1xf32>
      %cst_41 = arith.constant 1.600000e+01 : f32
      %53 = vector.broadcast %cst_41 : f32 to vector<1x1xf32>
      %54 = arith.divf %52, %53 : vector<1x1xf32>
      %55 = vector.broadcast %54 : vector<1x1xf32> to vector<16x1xf32>
      %56 = arith.subf %50, %55 : vector<16x1xf32>
      %57 = arith.mulf %56, %56 : vector<16x1xf32>
      %cst_42 = arith.constant dense<0.000000e+00> : vector<1xf32>
      %58 = vector.multi_reduction <add>, %57, %cst_42 [0] : vector<16x1xf32> to vector<1xf32>
      %59 = vector.shape_cast %58 : vector<1xf32> to vector<1x1xf32>
      %cst_43 = arith.constant 1.600000e+01 : f32
      %60 = vector.broadcast %cst_43 : f32 to vector<1x1xf32>
      %61 = arith.divf %59, %60 : vector<1x1xf32>
      %62 = vector.broadcast %54 : vector<1x1xf32> to vector<16x1xf32>
      %63 = arith.subf %50, %62 : vector<16x1xf32>
      %cst_44 = arith.constant 9.99999974E-6 : f32
      %64 = vector.broadcast %cst_44 : f32 to vector<1x1xf32>
      %65 = arith.addf %61, %64 : vector<1x1xf32>
      %66 = math.rsqrt %65 : vector<1x1xf32>
      %67 = vector.broadcast %66 : vector<1x1xf32> to vector<16x1xf32>
      %68 = arith.mulf %63, %67 : vector<16x1xf32>
      %c0_45 = arith.constant 0 : index
      %c0_46 = arith.constant 0 : index
      %69 = vector.load %arg9[%c0_45, %c0_46] : memref<16x1xf32, #tpu.memory_space<vmem>>, vector<16x1xf32>
      %70 = arith.mulf %68, %69 : vector<16x1xf32>
      %c0_47 = arith.constant 0 : index
      %c0_48 = arith.constant 0 : index
      %71 = vector.load %arg10[%c0_47, %c0_48] : memref<16x1xf32, #tpu.memory_space<vmem>>, vector<16x1xf32>
      %72 = arith.addf %70, %71 : vector<16x1xf32>
      %73 = arith.negf %72 : vector<16x1xf32>
      %74 = math.exp %73 : vector<16x1xf32>
      %cst_49 = arith.constant 1.000000e+00 : f32
      %75 = vector.broadcast %cst_49 : f32 to vector<16x1xf32>
      %76 = arith.addf %75, %74 : vector<16x1xf32>
      %77 = arith.divf %75, %76 : vector<16x1xf32>
      %c0_50 = arith.constant 0 : index
      %c0_51 = arith.constant 0 : index
      %c0_52 = arith.constant 0 : index
      %78 = vector.load %arg11[%c0_50, %c0_51, %c0_52] : memref<1x16x1xf32, #tpu.memory_space<vmem>>, vector<1x16x1xf32>
      %79 = vector.shape_cast %78 : vector<1x16x1xf32> to vector<16x1xf32>
      %80 = vector.shape_cast %77 : vector<16x1xf32> to vector<1x16x1xf32>
      tpu.vector_store %arg11[%c0_50, %c0_51, %c0_52], %80 {strides = array<i32>} : memref<1x16x1xf32, #tpu.memory_space<vmem>>, vector<1x16x1xf32>,
      %c0_53 = arith.constant 0 : index
      %c0_54 = arith.constant 0 : index
      %81 = vector.load %arg17[%c0_53, %c0_54] : memref<8x1xf32, #tpu.memory_space<vmem>>, vector<8x1xf32>
      %cst_55 = arith.constant 5.120000e+02 : f32
      %82 = vector.broadcast %cst_55 : f32 to vector<8x1xf32>
      %83 = arith.divf %81, %82 : vector<8x1xf32>
      %c0_56 = arith.constant 0 : index
      %c0_57 = arith.constant 0 : index
      %84 = vector.load %arg6[%c0_56, %c0_57] : memref<8x1xf32, #tpu.memory_space<vmem>>, vector<8x1xf32>
      %85 = arith.addf %83, %84 : vector<8x1xf32>
      %cst_58 = arith.constant dense<0xFF800000> : vector<1xf32>
      %86 = vector.multi_reduction <maximumf>, %85, %cst_58 [0] : vector<8x1xf32> to vector<1xf32>
      %87 = vector.shape_cast %86 : vector<1xf32> to vector<1x1xf32>
      %88 = vector.broadcast %87 : vector<1x1xf32> to vector<8x1xf32>
      %89 = arith.subf %85, %88 : vector<8x1xf32>
      %90 = math.exp %89 : vector<8x1xf32>
      %cst_59 = arith.constant dense<0.000000e+00> : vector<1xf32>
      %91 = vector.multi_reduction <add>, %90, %cst_59 [0] : vector<8x1xf32> to vector<1xf32>
      %92 = vector.shape_cast %91 : vector<1xf32> to vector<1x1xf32>
      %93 = vector.broadcast %92 : vector<1x1xf32> to vector<8x1xf32>
      %94 = arith.divf %90, %93 : vector<8x1xf32>
      %c0_60 = arith.constant 0 : index
      %c0_61 = arith.constant 0 : index
      %c0_62 = arith.constant 0 : index
      %95 = vector.load %arg12[%c0_60, %c0_61, %c0_62] : memref<1x8x1xf32, #tpu.memory_space<vmem>>, vector<1x8x1xf32>
      %96 = vector.shape_cast %95 : vector<1x8x1xf32> to vector<8x1xf32>
      %97 = vector.shape_cast %94 : vector<8x1xf32> to vector<1x8x1xf32>
      tpu.vector_store %arg12[%c0_60, %c0_61, %c0_62], %97 {strides = array<i32>} : memref<1x8x1xf32, #tpu.memory_space<vmem>>, vector<1x8x1xf32>,
      %c0_63 = arith.constant 0 : index
      %c0_64 = arith.constant 0 : index
      %98 = vector.load %arg7[%c0_63, %c0_64] : memref<8x1xf32, #tpu.memory_space<vmem>>, vector<8x1xf32>
      %99 = arith.mulf %94, %98 : vector<8x1xf32>
      %cst_65 = arith.constant dense<0.000000e+00> : vector<1xf32>
      %100 = vector.multi_reduction <add>, %99, %cst_65 [0] : vector<8x1xf32> to vector<1xf32>
      %101 = vector.shape_cast %100 : vector<1xf32> to vector<1x1xf32>
      %c0_66 = arith.constant 0 : index
      %c0_67 = arith.constant 0 : index
      %c0_68 = arith.constant 0 : index
      %102 = vector.load %arg13[%c0_66, %c0_67, %c0_68] : memref<1x1x1xf32, #tpu.memory_space<vmem>>, vector<1x1x1xf32>
      %103 = vector.shape_cast %102 : vector<1x1x1xf32> to vector<1x1xf32>
      %104 = vector.shape_cast %101 : vector<1x1xf32> to vector<1x1x1xf32>
      tpu.vector_store %arg13[%c0_66, %c0_67, %c0_68], %104 {strides = array<i32>} : memref<1x1x1xf32, #tpu.memory_space<vmem>>, vector<1x1x1xf32>,
    } else {
    }
    return
  }
  func.func @transform_0(%arg0: i32, %arg1: i32) -> (i32, i32, i32) {
    %c0_i32 = arith.constant 0 : i32
    %c0_i32_0 = arith.constant 0 : i32
    return %arg0, %c0_i32, %arg1 : i32, i32, i32
  }
  func.func @transform_1(%arg0: i32, %arg1: i32) -> (i32, i32) {
    %c0_i32 = arith.constant 0 : i32
    %c0_i32_0 = arith.constant 0 : i32
    %c0_i32_1 = arith.constant 0 : i32
    return %c0_i32, %c0_i32_0 : i32, i32
  }
  func.func @transform_2(%arg0: i32, %arg1: i32) -> (i32, i32) {
    %c0_i32 = arith.constant 0 : i32
    %c0_i32_0 = arith.constant 0 : i32
    %c0_i32_1 = arith.constant 0 : i32
    return %c0_i32, %c0_i32_0 : i32, i32
  }
  func.func @transform_3(%arg0: i32, %arg1: i32) -> (i32, i32) {
    %c0_i32 = arith.constant 0 : i32
    %c0_i32_0 = arith.constant 0 : i32
    %c0_i32_1 = arith.constant 0 : i32
    return %c0_i32, %c0_i32_0 : i32, i32
  }
  func.func @transform_4(%arg0: i32, %arg1: i32) -> (i32, i32) {
    %c0_i32 = arith.constant 0 : i32
    %c0_i32_0 = arith.constant 0 : i32
    %c0_i32_1 = arith.constant 0 : i32
    return %c0_i32, %c0_i32_0 : i32, i32
  }
  func.func @transform_5(%arg0: i32, %arg1: i32) -> (i32, i32) {
    %c0_i32 = arith.constant 0 : i32
    %c0_i32_0 = arith.constant 0 : i32
    %c0_i32_1 = arith.constant 0 : i32
    return %c0_i32, %c0_i32_0 : i32, i32
  }
  func.func @transform_6(%arg0: i32, %arg1: i32) -> (i32, i32) {
    %c0_i32 = arith.constant 0 : i32
    %c0_i32_0 = arith.constant 0 : i32
    %c0_i32_1 = arith.constant 0 : i32
    return %c0_i32, %c0_i32_0 : i32, i32
  }
  func.func @transform_7(%arg0: i32, %arg1: i32) -> (i32, i32) {
    %c0_i32 = arith.constant 0 : i32
    %c0_i32_0 = arith.constant 0 : i32
    %c0_i32_1 = arith.constant 0 : i32
    return %c0_i32, %c0_i32_0 : i32, i32
  }
  func.func @transform_8(%arg0: i32, %arg1: i32) -> (i32, i32) {
    %c0_i32 = arith.constant 0 : i32
    %c0_i32_0 = arith.constant 0 : i32
    %c0_i32_1 = arith.constant 0 : i32
    return %c0_i32, %c0_i32_0 : i32, i32
  }
  func.func @transform_9(%arg0: i32, %arg1: i32) -> (i32, i32, i32) {
    %c0_i32 = arith.constant 0 : i32
    %c0_i32_0 = arith.constant 0 : i32
    %c0_i32_1 = arith.constant 0 : i32
    return %arg0, %c0_i32, %c0_i32_0 : i32, i32, i32
  }
  func.func @transform_10(%arg0: i32, %arg1: i32) -> (i32, i32, i32) {
    %c0_i32 = arith.constant 0 : i32
    %c0_i32_0 = arith.constant 0 : i32
    %c0_i32_1 = arith.constant 0 : i32
    return %arg0, %c0_i32, %c0_i32_0 : i32, i32, i32
  }
  func.func @transform_11(%arg0: i32, %arg1: i32) -> (i32, i32, i32) {
    %c0_i32 = arith.constant 0 : i32
    %c0_i32_0 = arith.constant 0 : i32
    %c0_i32_1 = arith.constant 0 : i32
    return %arg0, %c0_i32, %c0_i32_0 : i32, i32, i32
  }
}

</mosaic_0001>

<bundles_post_ra>
// kernel: tpu_custom_call.1
= control target key start
LH: loop header
LB: loop body
LE: loop exit
PB: predicated region body
PF: predicated region fallthrough
CT: control target
= control target key end

     0   :  { %s1220_s17 = smov 0   ;;  %s1222_s18 = smov 0   ;;  %s1354_s0 = inlined_call_operand.vmem [shape: f32[2,16,512], index: 0, kind: input, shape index: {}]   ;;  %s1355_s1 = inlined_call_operand.vmem [shape: f32[17,16], index: 1, kind: input, shape index: {}]   ;;  %s1356_s2 = inlined_call_operand.vmem [shape: f32[16,8], index: 2, kind: input, shape index: {}]   ;;  %s1357_s3 = inlined_call_operand.vmem [shape: f32[8,1], index: 3, kind: input, shape index: {}]   ;;  %s1358_s4 = inlined_call_operand.vmem [shape: f32[8,1], index: 4, kind: input, shape index: {}]   ;;  %s1359_s5 = inlined_call_operand.vmem [shape: f32[8,1], index: 5, kind: input, shape index: {}]   ;;  %s1360_s6 = inlined_call_operand.vmem [shape: f32[16,1], index: 6, kind: input, shape index: {}]   ;;  %s1361_s7 = inlined_call_operand.vmem [shape: f32[16,1], index: 7, kind: input, shape index: {}]   ;;  %s1362_s8 = inlined_call_operand.vmem [shape: f32[16,1], index: 8, kind: input, shape index: {}]   ;;  %s1363_s9 = inlined_call_operand.vmem [shape: f32[2,16,1], index: 9, kind: output, shape index: {0}]   ;;  %s1364_s10 = inlined_call_operand.vmem [shape: f32[2,8,1], index: 10, kind: output, shape index: {1}]   ;;  %s1365_s11 = inlined_call_operand.vmem [shape: f32[2,1,1], index: 11, kind: output, shape index: {2}]  }
   0x1   :  { %s1224_s19 = smov 0  }
   0x2 LB: > { %s34_s20 = sadd.s32 1, %s1151_s18  ;;  %p1042_p0 = scmp.ge.s32.totalorder %s1155_s19, 1  ;;  %s1155_s19 = sphi %s1224_s19, %s22_s19   ;;  %s1151_s18 = sphi %s1222_s18, %s1367_s18   ;;  %s1147_s17 = sphi %s1220_s17, %s1366_s17  }
   0x3   : > { %p36_p1 = scmp.ge.s32.totalorder %s34_s20, 2  ;;  %p361_p2 = scmp.lt.s32.totalorder %s1155_s19, 3 }
   0x5   : > { %s1369_s20 = smov (%p36_p1, %s34_s20), 0  ;;  %p362_p3 = pnand %p1042_p0, %p361_p2 }
   0x6   : > { %p413_p4 = scmp.lt.s32.totalorder (!%p362_p3), %s1147_s17, 1  ;;  %v1157_v0 = vmov (!%p362_p3), 0.0   ;;  %v452_v13 = vld [vmem:[%s1355_s1] sm:$0xff] (!%p362_p3)  ;;  %vm455_vm0 = vcmask (!%p362_p3), 130048   ;;  %v453_v14 = vld [vmem:[%s1355_s1 + $0x8] sm:$0xff] (!%p362_p3)  ;;  %vm438_vm1 = vcmask (!%p362_p3), 0   ;;  %v651_v44 = vlaneseq (!%p362_p3) }
   0x7   : > { %365 = sbr.rel (%p362_p3) target bundleno = 1018 (0x3fa), region = 56  ;;  %529 = vmatprep.mubr.f32.mxu0 (!%p362_p3), %v1157_v0  ;;  %612 = vmatprep.mubr.f32.mxu1 (!%p362_p3), %v1157_v0  ;;  %v454_v15 = vld [vmem:[%s1355_s1 + $0x10] sm:$0x1] (!%p362_p3)  ;;  %v1158_v16 = vmov (!%p362_p3), -inf   ;;  %440 = vst.msk [vmem:[#allocation3] sm:$0x1] (!%p362_p3), %vm438_vm1, %v1157_v0 }
   0x8   : > { %439 = vst.msk [vmem:[#allocation2] sm:$0x1] (!%p362_p3), %vm438_vm1, %v1158_v16  ;;  %vm632_vm2 = vcmask (!%p362_p3), 1040384   ;;  %v1159_v39 = vmov (!%p362_p3), 0   ;;  %vm441_vm3 = vcmask (!%p362_p3), 7168   ;;  %v652_v45 = vshrl.u32 (!%p362_p3), %v651_v44, 7 }
   0x9   : > { %1106 = vset.pattern.permute.xlu0 (!%p362_p3), %v1159_v39  ;;  %442 = vst.msk [vmem:[#allocation4] sm:$0xff] (!%p362_p3), %vm441_vm3, %v1157_v0  ;;  %443 = vst.msk [vmem:[#allocation5] sm:$0xff] (!%p362_p3), %vm441_vm3, %v1157_v0  ;;  %vm745_vm4 = vcmask (!%p362_p3), 64512  }
   0xa   : > { %v653_v46 = vsub.s32 (!%p362_p3), 0, %v652_v45 }
   0xe   : > { %s1371_s17 = smov (!%p413_p4, %s1147_s17), 1 }
   0xf   : > { %s1061_s21 = sshll.u32 %s1371_s17, 6  ;;  %v631_v40 = vld [vmem:[#allocation2] sm:$0x1]  ;;  %s433_s13 = scalar_lea.vmem %s1365_s11, %s1371_s17 }
  0x10   : > { %s420_s24 = scalar_lea.vmem %s1354_s0, %s1061_s21  ;;  %s1062_s30 = sshll.u32 %s1371_s17, 4 }
  0x11   : > { %v445_v1 = vld [vmem:[%s420_s24 + $0x8] sm:$0xff]  ;;  %v447_v3 = vld [vmem:[%s420_s24 + $0x18] sm:$0xff]  ;;  %v444_v6 = vld [vmem:[%s420_s24] sm:$0xff]  ;;  %s426_s14 = scalar_lea.vmem %s1363_s9, %s1062_s30 }
  0x12   : > { %v449_v2 = vld [vmem:[%s420_s24 + $0x28] sm:$0xff]  ;;  %v451_v5 = vld [vmem:[%s420_s24 + $0x38] sm:$0xff]  ;;  %v448_v7 = vld [vmem:[%s420_s24 + $0x20] sm:$0xff] }
  0x13   : > { %v1071_v4 = vpack.c.bf16 %v449_v2, %v445_v1  ;;  %v1075_v8 = vpack.c.bf16 %v451_v5, %v447_v3  ;;  %v1073_v9 = vpack.c.bf16 %v448_v7, %v444_v6  ;;  %v446_v10 = vld [vmem:[%s420_s24 + $0x10] sm:$0xff] }
  0x14   : > { %v450_v11 = vld [vmem:[%s420_s24 + $0x30] sm:$0xff]  ;;  %s1047_s24 = sshll.u32 %s1371_s17, 3 }
  0x15   : > { %1072 = vmatprep.subr.bf16.mxu0 %v1071_v4  ;;  %v1077_v12 = vpack.c.bf16 %v450_v11, %v446_v10  ;;  %1076 = vmatprep.subr.bf16.mxu1 %v1075_v8  ;;  %s430_s27 = scalar_lea.vmem %s1364_s10, %s1047_s24 }
  0x16   : > { %1074 = vmatpush1.bf16.msra.mxu0 %v1073_v9 }
  0x17   : > { %1078 = vmatpush1.bf16.msra.mxu1 %v1077_v12 }
  0x19   : > { %1048 = vmatmul.mubr.msk.f32.vlgmr.msra.gmra.mrb[0].mxu0 %vm455_vm0, %v452_v13 }
  0x1a   : > { %1051 = vmatmul.mubr.msk.f32.vlgmr.msra.gmra.mrb[0].mxu1 %vm455_vm0, %v452_v13  ;;  %535 = vmatprep.mubr.f32.mxu0 %v1157_v0 }
  0x1b   : > { %618 = vmatprep.mubr.f32.mxu1 %v1157_v0 }
  0x1d   : > { %1049 = vmatmul.mubr.msk.f32.gmra.mrb[2].mxu0 %vm455_vm0, %v453_v14 }
  0x1e   : > { %1052 = vmatmul.mubr.msk.f32.gmra.mrb[2].mxu1 %vm455_vm0, %v453_v14  ;;  %541 = vmatprep.mubr.f32.mxu0 %v1157_v0 }
  0x1f   : > { %624 = vmatprep.mubr.f32.mxu1 %v1157_v0 }
  0x21   : > { %1050 = vmatmul.mubr.msk.f32.gmra.mrb[4].mxu0 %vm455_vm0, %v454_v15 }
  0x22   : > { %1053 = vmatmul.mubr.msk.f32.gmra.mrb[4].mxu1 %vm455_vm0, %v454_v15  ;;  %v741_v15 = vld [vmem:[%s1356_s2] sm:$0xff] }
  0x23   : > { %1068 = vmatprep.mubr.msk.f32.mxu0 %vm745_vm4, %v741_v15 }
  0xec   : > { %v531_v17 = vpop.f32.mrb[0].mxu0 }
  0xed   : > { %v1262_v18 = vpop.f32.mrb[0].mxu1  ;;  %v1264_v19 = vpop.f32.mrb[1].mxu0 }
  0xee   : > { %v1266_v20 = vpop.f32.mrb[1].mxu1 }
  0xf0   : > { %v537_v21 = vpop.f32.mrb[2].mxu0 }
  0xf1   : > { %v620_v22 = vpop.f32.mrb[2].mxu1  ;;  %v539_v23 = vpop.f32.mrb[3].mxu0 }
  0xf2   : > { %v719_v24 = vadd.f32 %v539_v23, %v537_v21  ;;  %v622_v25 = vpop.f32.mrb[3].mxu1 }
  0xf4   : > { %v720_v26 = vadd.f32 %v719_v24, %v620_v22  ;;  %v543_v27 = vpop.f32.mrb[4].mxu0  ;;  %v681_v22 = vld [vmem:[#allocation4] sm:$0xff] }
  0xf5   : > { %v633_v28 = vsel %vm632_vm2, %v543_v27, -inf  ;;  %v626_v29 = vpop.f32.mrb[4].mxu1  ;;  %v545_v30 = vpop.f32.mrb[5].mxu0 }
  0xf6   : > { %v721_v31 = vadd.f32 %v720_v26, %v622_v25  ;;  %v635_v32 = vsel %vm632_vm2, %v626_v29, -inf  ;;  %v634_v33 = vsel %vm632_vm2, %v545_v30, -inf  ;;  %v628_v34 = vpop.f32.mrb[5].mxu1 }
  0xf7   : > { %v636_v35 = vsel %vm632_vm2, %v628_v34, -inf  ;;  %v637_v36 = vmax.f32 %v633_v28, %v634_v33 }
  0xf8   : > { %v638_v37 = vmax.f32 %v635_v32, %v636_v35 }
  0xfa   : > { %v639_v38 = vmax.f32 %v637_v36, %v638_v37  ;;  %v739_v37 = vld [vmem:[%s1357_s3] sm:$0xff] }
  0xfc   : > { %640 = vmax.xlane.f32.xlu0 %v639_v38 }
 0x189   : > { %v641_v41 = vpop.xlane.xlu0 %640 }
 0x18a   : > { %v642_v42 = vmax.f32 %v631_v40, %v641_v41 }
 0x18c   : > { %v643_v43 = vsub.f32 %v631_v40, %v642_v42  ;;  %717 = vst.msk [vmem:[#allocation2] sm:$0x1] %vm438_vm1, %v642_v42  ;;  %648 = vperm.xlu0 %1106, %v642_v42   ;;  %v742_v42 = vld [vmem:[%s1356_s2 + $0x8] sm:$0xff] }
 0x18e   : > { %v644_v16 = vmul.f32 1.442695, %v643_v43 }
 0x20b   : > { %v649_v47 = vpop.permute.xlu0 %648 }
 0x20c   : > { %v654_v48 = vrot.slane %v649_v47, %v653_v46 }
 0x20e   : > { %v655_v49 = vsub.f32 %v543_v27, %v654_v48  ;;  %v656_v50 = vsub.f32 %v545_v30, %v654_v48  ;;  %v657_v51 = vsub.f32 %v626_v29, %v654_v48  ;;  %v658_v52 = vsub.f32 %v628_v34, %v654_v48  ;;  %v718_v27 = vld [vmem:[#allocation5] sm:$0xff] }
 0x210   : > { %v659_v53 = vmul.f32 1.442695, %v655_v49  ;;  %v661_v54 = vmul.f32 1.442695, %v656_v50  ;;  %v663_v55 = vmul.f32 1.442695, %v657_v51 }
 0x211   : > { %v665_v56 = vmul.f32 1.442695, %v658_v52 }
 0x212   : > { %1107 = vpow2.f32 %v659_v53 }
 0x213   : > { %1109 = vpow2.f32 %v661_v54 }
 0x214   : > { %1111 = vpow2.f32 %v663_v55 }
 0x215   : > { %1113 = vpow2.f32 %v665_v56 }
 0x216   : > { %1115 = vpow2.f32 %v644_v16 }
 0x21c   : > { %v1108_v57 = vpop.eup %1107 }
 0x21d   : > { %v1110_v58 = vpop.eup %1109  ;;  %v669_v59 = vsel %vm632_vm2, %v1108_v57, 0.0  ;;  %v692_v60 = vrot.slane %v1108_v57, %v653_v46 }
 0x21e   : > { %v1112_v61 = vpop.eup %1111  ;;  %v670_v62 = vsel %vm632_vm2, %v1110_v58, 0.0  ;;  %v696_v63 = vrot.slane %v1110_v58, %v653_v46 }
 0x21f   : > { %v1114_v0 = vpop.eup %1113  ;;  %v671_v1 = vadd.f32 %v670_v62, %v669_v59  ;;  %v700_v2 = vrot.slane %v1112_v61, %v653_v46  ;;  %v705_v3 = vmul.f32 %v692_v60, %v531_v17  ;;  %v672_v4 = vsel %vm632_vm2, %v1112_v61, 0.0  ;;  %v903_v59 = vld [vmem:[%s1359_s5] sm:$0xff] }
 0x220   : > { %v704_v5 = vrot.slane %v1114_v0, %v653_v46  ;;  %v706_v6 = vmul.f32 %v696_v63, %v1264_v19  ;;  %v674_v9 = vsel %vm632_vm2, %v1114_v0, 0.0  ;;  %v1116_v17 = vpop.eup %1115 }
 0x221   : > { %v673_v7 = vadd.f32 %v672_v4, %v671_v1  ;;  %v707_v8 = vmul.f32 %v700_v2, %v1262_v18  ;;  %v667_v18 = vld [vmem:[#allocation3] sm:$0x1] }
 0x222   : > { %v708_v10 = vmul.f32 %v704_v5, %v1266_v20  ;;  %v709_v11 = vadd.f32 %v706_v6, %v705_v3  ;;  %v668_v19 = vmul.f32 %v1116_v17, %v667_v18  ;;  %v686_v20 = vrot.slane %v1116_v17, %v653_v46  ;;  %v744_v5 = vld [vmem:[%s1360_s6 + $0x8] sm:$0xff]  ;;  %v743_v6 = vld [vmem:[%s1360_s6] sm:$0xff] }
 0x223   : > { %v675_v12 = vadd.f32 %v674_v9, %v673_v7 }
 0x224   : > { %v710_v13 = vadd.f32 %v709_v11, %v707_v8  ;;  %v688_v24 = vmul.f32 %v686_v20, %v681_v22 }
 0x225   : > { %676 = vadd.xlane.f32.xlu1 %v675_v12 }
 0x226   : > { %v711_v14 = vadd.f32 %v710_v13, %v708_v10 }
 0x229   : > { %712 = vadd.xlane.f32.xlu1 %v711_v14 }
 0x22d   : > { %722 = vadd.xlane.f32.xlu1 %v721_v31  ;;  %v881_v31 = vld [vmem:[%s1358_s4] sm:$0xff] }
 0x2b2   : > { %v677_v21 = vpop.xlane.xlu1 %676 }
 0x2b3   : > { %v678_v23 = vadd.f32 %v677_v21, %v668_v19 }
 0x2b5   : > { %680 = vst.msk [vmem:[#allocation3] sm:$0x1] %vm438_vm1, %v678_v23 }
 0x2b6   : > { %v713_v25 = vpop.xlane.xlu1 %712 }
 0x2b7   : > { %v714_v26 = vadd.f32 %v713_v25, %v688_v24 }
 0x2b9   : > { %716 = vst.msk [vmem:[#allocation4] sm:$0xff] %vm441_vm3, %v714_v26 }
 0x2ba   : > { %v723_v28 = vpop.xlane.xlu1 %722 }
 0x2bb   : > { %v724_v29 = vadd.f32 %v723_v28, %v718_v27 }
 0x2bc   : > { %v1054_v30 = vld [vmem:[#allocation3] ss:$0 sm:$0xff] }
 0x2bd   : > { %725 = vst.msk [vmem:[#allocation5] sm:$0xff] %vm441_vm3, %v724_v29  ;;  %1117 = vrcp.f32 %v1054_v30 }
 0x2c0   : > { %v729_v36 = vld [vmem:[#allocation4] sm:$0xff] }
 0x2c4   : > { %v878_v32 = vld [vmem:[#allocation5] sm:$0xff] }
 0x2c5   : > { %v880_v33 = vmul.f32 0.001953125, %v878_v32 }
 0x2c7   : > { %v1118_v34 = vpop.eup %1117  ;;  %v882_v35 = vadd.f32 %v881_v31, %v880_v33 }
 0x2c8   : > { %v738_v38 = vmul.f32 %v1118_v34, %v729_v36 }
 0x2c9   : > { %v883_v39 = vsel %vm441_vm3, %v882_v35, -inf }
 0x2ca   : > { %v884_v40 = vrot.slane %v883_v39, 4  ;;  %v740_v41 = vadd.f32 %v739_v37, %v738_v38  ;;  %v856_v37 = vld [vmem:[%s1361_s7] sm:$0xff]  ;;  %v857_v38 = vld [vmem:[%s1361_s7 + $0x8] sm:$0xff] }
 0x2cc   : > { %v885_v43 = vmax.f32 %v883_v39, %v884_v40  ;;  %1066 = vmatprep.subr.mxu0 %v740_v41 }
 0x2cd   : > { %1067 = vmatpush3.msra.mxu0 %v740_v41  ;;  %v860_v41 = vld [vmem:[%s1362_s8] sm:$0xff] }
 0x2ce   : > { %v886_v44 = vrot.slane %v885_v43, 2  ;;  %1069 = vmatmul.mubr.msk.f32.vlgmr.msra.gmra.mrb[6].mxu0 %vm745_vm4, %v742_v42  ;;  %v861_v42 = vld [vmem:[%s1362_s8 + $0x8] sm:$0xff] }
 0x2d0   : > { %v887_v45 = vmax.f32 %v885_v43, %v886_v44 }
 0x2d2   : > { %v888_v46 = vrot.slane %v887_v45, 1 }
 0x2d4   : > { %v889_v47 = vmax.f32 %v887_v45, %v888_v46 }
 0x2d6   : > { %v890_v48 = vsub.f32 %v882_v35, %v889_v47 }
 0x2d8   : > { %v891_v49 = vmul.f32 1.442695, %v890_v48 }
 0x2da   : > { %1119 = vpow2.f32 %v891_v49 }
 0x2e4   : > { %v1120_v50 = vpop.eup %1119 }
 0x2e5   : > { %v893_v51 = vsel %vm441_vm3, %v1120_v50, 0.0 }
 0x2e6   : > { %v894_v52 = vrot.slane %v893_v51, 4 }
 0x2e8   : > { %v895_v53 = vadd.f32 %v894_v52, %v893_v51 }
 0x2ea   : > { %v896_v54 = vrot.slane %v895_v53, 2 }
 0x2ec   : > { %v897_v55 = vadd.f32 %v896_v54, %v895_v53 }
 0x2ee   : > { %v898_v56 = vrot.slane %v897_v55, 1 }
 0x2f0   : > { %v899_v57 = vadd.f32 %v898_v56, %v897_v55 }
 0x2f2   : > { %1121 = vrcp.f32 %v899_v57 }
 0x2fc   : > { %v1122_v58 = vpop.eup %1121 }
 0x2fd   : > { %v901_v60 = vmul.f32 %v1122_v58, %v1120_v50 }
 0x2ff   : > { %902 = vst.msk [vmem:[%s430_s27] sm:$0xff] %vm441_vm3, %v901_v60  ;;  %v904_v61 = vmul.f32 %v903_v59, %v901_v60 }
 0x301   : > { %v905_v62 = vsel %vm441_vm3, %v904_v61, 0.0 }
 0x302   : > { %v906_v63 = vrot.slane %v905_v62, 4 }
 0x304   : > { %v907_v0 = vadd.f32 %v906_v63, %v905_v62 }
 0x306   : > { %v908_v1 = vrot.slane %v907_v0, 2 }
 0x308   : > { %v909_v2 = vadd.f32 %v908_v1, %v907_v0 }
 0x30a   : > { %v910_v3 = vrot.slane %v909_v2, 1 }
 0x30c   : > { %v911_v4 = vadd.f32 %v910_v3, %v909_v2 }
 0x30e   : > { %912 = vst.msk [vmem:[%s433_s13] sm:$0x1] %vm438_vm1, %v911_v4 }
 0x3a1   : > { %v1070_v7 = vpop.f32.mrb[6].mxu0 }
 0x3a2   : > { %v824_v8 = vadd.f32 %v1070_v7, %v744_v5  ;;  %v818_v9 = vpop.f32.mrb[7].mxu0 }
 0x3a3   : > { %v819_v10 = vadd.f32 %v818_v9, %v743_v6 }
 0x3a4   : > { %v828_v11 = vsel %vm441_vm3, %v824_v8, 0.0 }
 0x3a5   : > { %v827_v12 = vsel %vm441_vm3, %v819_v10, 0.0 }
 0x3a6   : > { %v829_v13 = vadd.f32 %v828_v11, %v827_v12 }
 0x3a8   : > { %v830_v14 = vrot.slane %v829_v13, 4 }
 0x3aa   : > { %v831_v15 = vadd.f32 %v830_v14, %v829_v13 }
 0x3ac   : > { %v832_v16 = vrot.slane %v831_v15, 2 }
 0x3ae   : > { %v833_v17 = vadd.f32 %v832_v16, %v831_v15 }
 0x3b0   : > { %v834_v18 = vrot.slane %v833_v17, 1 }
 0x3b2   : > { %v835_v19 = vadd.f32 %v834_v18, %v833_v17 }
 0x3b4   : > { %v837_v20 = vmul.f32 0.0625, %v835_v19 }
 0x3b6   : > { %v838_v21 = vsub.f32 %v819_v10, %v837_v20  ;;  %v839_v22 = vsub.f32 %v824_v8, %v837_v20 }
 0x3b8   : > { %v840_v23 = vmul.f32 %v838_v21, %v838_v21  ;;  %v841_v24 = vmul.f32 %v839_v22, %v839_v22 }
 0x3ba   : > { %v842_v25 = vsel %vm441_vm3, %v840_v23, 0.0  ;;  %v843_v26 = vsel %vm441_vm3, %v841_v24, 0.0 }
 0x3bb   : > { %v844_v27 = vadd.f32 %v843_v26, %v842_v25 }
 0x3bd   : > { %v845_v28 = vrot.slane %v844_v27, 4 }
 0x3bf   : > { %v846_v29 = vadd.f32 %v845_v28, %v844_v27 }
 0x3c1   : > { %v847_v30 = vrot.slane %v846_v29, 2 }
 0x3c3   : > { %v848_v31 = vadd.f32 %v847_v30, %v846_v29 }
 0x3c5   : > { %v849_v32 = vrot.slane %v848_v31, 1 }
 0x3c7   : > { %v850_v33 = vadd.f32 %v849_v32, %v848_v31 }
 0x3c9   : > { %v851_v34 = vmul.f32 0.0625, %v850_v33 }
 0x3cb   : > { %v852_v35 = vadd.f32 1e-05, %v851_v34 }
 0x3cd   : > { %1123 = vrsqrt.f32 %v852_v35 }
 0x3d7   : > { %v1124_v36 = vpop.eup %1123 }
 0x3d8   : > { %v854_v39 = vmul.f32 %v1124_v36, %v838_v21  ;;  %v855_v40 = vmul.f32 %v1124_v36, %v839_v22 }
 0x3da   : > { %v858_v43 = vmul.f32 %v856_v37, %v854_v39  ;;  %v859_v44 = vmul.f32 %v857_v38, %v855_v40 }
 0x3dc   : > { %v862_v45 = vadd.f32 %v860_v41, %v858_v43  ;;  %v863_v46 = vadd.f32 %v861_v42, %v859_v44 }
 0x3de   : > { %v1057_v47 = vmul.f32 -1.442695, %v862_v45  ;;  %v1058_v48 = vmul.f32 -1.442695, %v863_v46 }
 0x3e0   : > { %1125 = vpow2.f32 %v1057_v47 }
 0x3e1   : > { %1127 = vpow2.f32 %v1058_v48 }
 0x3ea   : > { %v1126_v49 = vpop.eup %1125 }
 0x3eb   : > { %v1128_v50 = vpop.eup %1127  ;;  %v870_v51 = vadd.f32 1.0, %v1126_v49 }
 0x3ec   : > { %v871_v52 = vadd.f32 1.0, %v1128_v50 }
 0x3ed   : > { %1129 = vrcp.f32 %v870_v51 }
 0x3ee   : > { %1131 = vrcp.f32 %v871_v52 }
 0x3f7   : > { %v1130_v53 = vpop.eup %1129 }
 0x3f8   : > { %v1132_v54 = vpop.eup %1131  ;;  %876 = vst.msk [vmem:[%s426_s14] sm:$0xff] %vm441_vm3, %v1130_v53 }
 0x3f9   : > { %877 = vst.msk [vmem:[%s426_s14 + $0x8] sm:$0xff] %vm441_vm3, %v1132_v54 }
 0x3fa PF: > { %s22_s19 = sadd.s32 1, %s1155_s19   ;;  %s1366_s17 = smov %s1151_s18 }
 0x3fb   : > { %p19_p5 = scmp.ge.s32.totalorder %s22_s19, 4   ;;  %s1367_s18 = smov %s1369_s20 }
 0x3fd   :  { %21 = sbr.rel (!%p19_p5) target bundleno = 2 (0x2), region = 118 }

</bundles_post_ra>
